<compile_context>
chip_gen: v6e
topology: v6e:2x2x1
jax: 0.10.0
libtpu: 0.0.40
codegen_flags: <defaults>
</compile_context>

<pallas_src>
import math
from functools import partial

import jax
import jax.numpy as jnp
from jax.experimental import pallas as pl
from jax.experimental.pallas import tpu as pltpu


# ----------------------------------------------------------------------------- kernel

def encoder_block_kernel(
    x_ref,        # (TB, D)   f32
    wqkv_ref,     # (D, 3E)   bf16, columns head-major [Q | K | V]; Q columns pre-scaled by 1/sqrt(hd)
    bqkv_ref,     # (1, 3E)   f32, same permutation / scaling
    wo_ref,       # (E, D)    bf16
    w1_ref,       # (D, F)    bf16
    b1_ref,       # (1, F)    f32
    w2_ref,       # (F, D)    bf16
    dvec_ref,     # (6, D)    f32 rows: [bo, ln1w, ln1b, b2, ln2w, ln2b]
    out_ref,      # (TB, D)   f32
    *, num_heads, head_dim, eps=1e-5,
):
    H, hd = num_heads, head_dim
    E = H * hd
    x = x_ref[...].astype(jnp.float32)                       # (TB, D)
    mm_dt = wqkv_ref.dtype

    # ---- fused QKV projection: one MXU matmul, f32 accumulation ----
    qkv = jnp.dot(x.astype(mm_dt), wqkv_ref[...],
                  preferred_element_type=jnp.float32) + bqkv_ref[...]       # (TB, 3E)
    # q/k/v stay 2-D head-major along lanes: no (TB, H, hd) reshape / relayout.
    q = qkv[:, 0 * E:1 * E]
    k = qkv[:, 1 * E:2 * E]
    v = qkv[:, 2 * E:3 * E]

    # ---- per-row HxH head attention on the VPU/XLU (no tiny batched MXU matmuls) ----
    def head(a, i):
        return a[:, i * hd:(i + 1) * hd]                     # static lane slice, (TB, hd)

    values_cols = []
    for hq in range(H):
        qh = head(q, hq)                                                       # (TB, hd)
        logits = [jnp.sum(qh * head(k, g), axis=-1, keepdims=True)             # (TB, 1)
                  for g in range(H)]                                           # scale pre-folded
        m = logits[0]
        for g in range(1, H):
            m = jnp.maximum(m, logits[g])
        e = [jnp.exp(lg - m) for lg in logits]
        denom = e[0]
        for g in range(1, H):
            denom = denom + e[g]
        inv = pl.reciprocal(denom, approx=True)                                # EUP slot
        acc = (e[0] * inv) * head(v, 0)
        for g in range(1, H):
            acc = acc + (e[g] * inv) * head(v, g)
        values_cols.append(acc)                                                # (TB, hd)
    values = jnp.concatenate(values_cols, axis=-1)                             # (TB, E) head-major

    attn_out = jnp.dot(values.astype(mm_dt), wo_ref[...],
                       preferred_element_type=jnp.float32) + dvec_ref[0:1, :]  # (TB, D)

    # ---- residual + LayerNorm 1 (dropout p=0.0 -> identity); single-pass variance ----
    x1 = x + attn_out
    mean1 = jnp.mean(x1, axis=-1, keepdims=True)
    var1 = jnp.mean(x1 * x1, axis=-1, keepdims=True) - mean1 * mean1
    xn1 = (x1 - mean1) * jax.lax.rsqrt(var1 + eps) * dvec_ref[1:2, :] + dvec_ref[2:3, :]

    # ---- feed-forward: Linear -> ReLU -> Linear ----
    # TODO(synk): F-blocked streaming of w1/w2 for production sizes (see header).
    hact = jnp.maximum(
        jnp.dot(xn1.astype(mm_dt), w1_ref[...], preferred_element_type=jnp.float32)
        + b1_ref[...], 0.0)
    ff = jnp.dot(hact.astype(mm_dt), w2_ref[...],
                 preferred_element_type=jnp.float32) + dvec_ref[3:4, :]

    # ---- residual + LayerNorm 2 ----
    x2 = xn1 + ff
    mean2 = jnp.mean(x2, axis=-1, keepdims=True)
    var2 = jnp.mean(x2 * x2, axis=-1, keepdims=True) - mean2 * mean2
    out_ref[...] = ((x2 - mean2) * jax.lax.rsqrt(var2 + eps)
                    * dvec_ref[4:5, :] + dvec_ref[5:6, :]).astype(out_ref.dtype)


# ----------------------------------------------------------------------------- wrapper helpers

_SINGLE_BUFFER_SUPPORTED = None


def _single_buffer_supported():
    """Probe (once) whether this JAX/Mosaic build accepts pipeline_mode=pl.Buffered(1) on a
    pallas_call BlockSpec.  Constant-index weights don't benefit from double buffering, so
    single-buffering them halves their VMEM footprint; fall back gracefully if unsupported."""
    global _SINGLE_BUFFER_SUPPORTED
    if _SINGLE_BUFFER_SUPPORTED is None:
        def _copy(x_ref, o_ref):
            o_ref[...] = x_ref[...]
        try:
            spec = pl.BlockSpec((8, 128), lambda i: (0, 0), pipeline_mode=pl.Buffered(1))
            fn = pl.pallas_call(
                _copy,
                out_shape=jax.ShapeDtypeStruct((8, 128), jnp.float32),
                grid=(1,),
                in_specs=[spec],
                out_specs=pl.BlockSpec((8, 128), lambda i: (0, 0)),
            )
            jax.block_until_ready(fn(jnp.zeros((8, 128), jnp.float32)))
            _SINGLE_BUFFER_SUPPORTED = True
        except Exception:
            _SINGLE_BUFFER_SUPPORTED = False
    return _SINGLE_BUFFER_SUPPORTED


def _choose_batch_tile(B, block_b):
    """Pick a batch tile TB that (a) is a multiple of 8 or equals B (f32 sublane tiling),
    (b) divides B exactly (no pad/slice round trip), and (c) yields >=2 grid programs when
    possible so the 'parallel' batch axis can shard across both v7x TensorCores."""
    if B <= 8 or B % 8 != 0:
        return B                      # single tile (demo shapes / ragged B)
    tb = min(block_b, max(8, (B // 2) // 8 * 8))
    while B % tb:
        tb -= 8
    return tb


def prepare_encoder_params(params, num_heads, matmul_dtype=jnp.bfloat16):
    """One-time weight preprocessing (hoisted out of the per-call path):
    head-major column permutation of the fused QKV weight, folding of the 1/sqrt(hd)
    attention scale into the Q columns, transposes, bf16 casts, and packing of all
    D-wide row vectors into a single (6, D) operand."""
    D = params["ln1w"].shape[0]
    E = D
    hd = E // num_heads
    scale = 1.0 / math.sqrt(hd)

    # Column permutation so Q/K/V occupy contiguous head-major blocks [0:E | E:2E | 2E:3E]
    # (matches torch's reshape(B, H, 3*hd).chunk(3, dim=-1)).  Layout plumbing only.
    h_off = jnp.arange(num_heads)[:, None] * (3 * hd)
    d_idx = jnp.arange(hd)[None, :]
    q_cols = (h_off + d_idx).reshape(-1)
    k_cols = (h_off + hd + d_idx).reshape(-1)
    v_cols = (h_off + 2 * hd + d_idx).reshape(-1)
    perm = jnp.concatenate([q_cols, k_cols, v_cols])

    # Fold the softmax scale into the Q projection (weights + bias) -> no per-tile multiply.
    col_scale = jnp.concatenate(
        [jnp.full((E,), scale, jnp.float32), jnp.ones((2 * E,), jnp.float32)])

    wqkv_t = params["wqkv"].T[:, perm].astype(jnp.float32) * col_scale[None, :]
    bqkv = (params["bqkv"][perm].astype(jnp.float32) * col_scale)[None, :]

    return dict(
        wqkv=wqkv_t.astype(matmul_dtype),                   # (D, 3E)
        bqkv=bqkv,                                          # (1, 3E) f32
        wo=params["wo"].T.astype(matmul_dtype),             # (E, D)
        w1=params["w1"].T.astype(matmul_dtype),             # (D, F)
        b1=params["b1"][None, :].astype(jnp.float32),       # (1, F)
        w2=params["w2"].T.astype(matmul_dtype),             # (F, D)
        dvec=jnp.stack([params["bo"], params["ln1w"], params["ln1b"],
                        params["b2"], params["ln2w"], params["ln2b"]],
                       axis=0).astype(jnp.float32),         # (6, D)
        num_heads=num_heads,
        head_dim=hd,
    )


def encoder_block_pallas(x, prepared, *, block_b=256):
    B, D = x.shape
    H = prepared["num_heads"]
    hd = prepared["head_dim"]
    E = H * hd
    assert E == D, "embed_dim must equal input_dim in this module"

    wqkv, bqkv = prepared["wqkv"], prepared["bqkv"]
    wo, w1, b1, w2, dvec = (prepared[k] for k in ("wo", "w1", "b1", "w2", "dvec"))
    F_dim = w1.shape[1]

    TB = _choose_batch_tile(B, block_b)
    grid = (B // TB,)
    single_buf = _single_buffer_supported()

    # Generation-aware VMEM budget: resident params (+double buffer if needed),
    # double-buffered x/out tiles, and f32 activation slack; cap at 80% of physical.
    weight_bufs = 1 if single_buf else 2
    param_bytes = weight_bufs * sum(int(a.size) * a.dtype.itemsize
                                    for a in (wqkv, bqkv, wo, w1, b1, w2, dvec))
    io_bytes = 2 * 2 * TB * D * 4
    act_bytes = TB * (3 * E + F_dim + 8 * D) * 4
    budget = param_bytes + io_bytes + act_bytes
    try:
        vmem_cap = int(pltpu.get_tpu_info().vmem_capacity_bytes)
    except Exception:
        vmem_cap = 64 * 1024 * 1024
    vmem_limit = int(min(0.80 * vmem_cap, max(32 * 1024 * 1024, 2 * budget)))

    const2 = lambda i: (0, 0)
    if single_buf:
        wspec = lambda a: pl.BlockSpec(a.shape, const2, pipeline_mode=pl.Buffered(1))
    else:
        wspec = lambda a: pl.BlockSpec(a.shape, const2)

    kernel = partial(encoder_block_kernel, num_heads=H, head_dim=hd)
    out = pl.pallas_call(
        kernel,
        out_shape=jax.ShapeDtypeStruct((B, D), jnp.float32),
        grid=grid,
        in_specs=[
            pl.BlockSpec((TB, D), lambda i: (i, 0)),   # x: batch-tiled, double-buffered
            wspec(wqkv), wspec(bqkv), wspec(wo),
            wspec(w1), wspec(b1), wspec(w2), wspec(dvec),
        ],
        out_specs=pl.BlockSpec((TB, D), lambda i: (i, 0)),
        compiler_params=pltpu.CompilerParams(
            dimension_semantics=("parallel",),          # v7x: shard batch across both TCs
            vmem_limit_bytes=vmem_limit,
        ),
    )(x, wqkv, bqkv, wo, w1, b1, w2, dvec)
    return out


# ----------------------------------------------------------------------------- init & reference

def init_params(key, input_dim, num_heads, dim_feedforward):
    embed_dim = input_dim
    keys = jax.random.split(key, 6)

    def xavier_uniform(k, shape):  # torch-style (out_features, in_features)
        fan_out, fan_in = shape
        bound = math.sqrt(6.0 / (fan_in + fan_out))
        return jax.random.uniform(k, shape, jnp.float32, -bound, bound)

    def torch_default_linear(kw, kb, out_f, in_f):
        bound = 1.0 / math.sqrt(in_f)
        w = jax.random.uniform(kw, (out_f, in_f), jnp.float32, -bound, bound)
        b = jax.random.uniform(kb, (out_f,), jnp.float32, -bound, bound)
        return w, b

    params = dict(
        wqkv=xavier_uniform(keys[0], (3 * embed_dim, input_dim)),
        bqkv=jnp.zeros((3 * embed_dim,), jnp.float32),
        wo=xavier_uniform(keys[1], (embed_dim, embed_dim)),
        bo=jnp.zeros((embed_dim,), jnp.float32),
        ln1w=jnp.ones((input_dim,), jnp.float32),
        ln1b=jnp.zeros((input_dim,), jnp.float32),
        ln2w=jnp.ones((input_dim,), jnp.float32),
        ln2b=jnp.zeros((input_dim,), jnp.float32),
    )
    params["w1"], params["b1"] = torch_default_linear(keys[2], keys[3], dim_feedforward, input_dim)
    params["w2"], params["b2"] = torch_default_linear(keys[4], keys[5], input_dim, dim_feedforward)
    return params


def encoder_block_reference(x, params, num_heads, matmul_dtype=jnp.float32):
    """Pure-JAX mirror of the PyTorch forward pass (optionally bf16-matched matmuls)."""
    B, D = x.shape
    hd = D // num_heads
    eps = 1e-5
    md = matmul_dtype

    def mm(a, w_t):
        return jnp.dot(a.astype(md), w_t.astype(md), preferred_element_type=jnp.float32)

    def layernorm(y, w, b):
        m = jnp.mean(y, -1, keepdims=True)
        v = jnp.mean((y - m) ** 2, -1, keepdims=True)
        return (y - m) * jax.lax.rsqrt(v + eps) * w + b

    qkv = mm(x, params["wqkv"].T) + params["bqkv"]
    qkv = qkv.reshape(B, num_heads, 3 * hd)
    q, k, v = jnp.split(qkv, 3, axis=-1)
    logits = jnp.einsum("bhd,bgd->bhg", q, k) / math.sqrt(hd)
    attn = jax.nn.softmax(logits, axis=-1)
    values = jnp.einsum("bhg,bgd->bhd", attn, v).reshape(B, D)
    o = mm(values, params["wo"].T) + params["bo"]
    x1 = layernorm(x + o, params["ln1w"], params["ln1b"])
    h = jnp.maximum(mm(x1, params["w1"].T) + params["b1"], 0.0)
    ff = mm(h, params["w2"].T) + params["b2"]
    return layernorm(x1 + ff, params["ln2w"], params["ln2b"])


# ----------------------------------------------------------------------------- main

if __name__ == "__main__":
    batch = 8
    input_dim = 32
    num_heads = 4
    dim_feedforward = 64

    key = jax.random.PRNGKey(0)
    kx, kp = jax.random.split(key)
    x = jax.random.normal(kx, (batch, input_dim), dtype=jnp.float32)
    params = init_params(kp, input_dim, num_heads, dim_feedforward)

    # One-time weight preparation (hoisted out of the per-call path).
    prepared = prepare_encoder_params(params, num_heads)

    out = encoder_block_pallas(x, prepared)
    out = jax.block_until_ready(out)
    assert out.shape == (batch, input_dim)

    # Semantic check vs. full-f32 reference (loose tolerance: kernel uses bf16 matmuls).
    ref_f32 = encoder_block_reference(x, params, num_heads)
    assert jnp.allclose(out, ref_f32, atol=5e-2, rtol=5e-2), "mismatch vs f32 reference"

    # Precision-matched check (bf16 matmul operands, f32 accumulation) -> tighter tolerance.
    ref_bf16 = encoder_block_reference(x, params, num_heads, matmul_dtype=jnp.bfloat16)
    assert jnp.allclose(out, ref_bf16, atol=2e-2, rtol=2e-2), "mismatch vs bf16-matched reference"

    print("KERNEL_OK")
</pallas_src>

<mosaic_0001>
module attributes {stable_mosaic.version = 11 : i64} {
  func.func @_copy(%arg0: i32, %arg1: memref<8x128xf32, #tpu.memory_space<vmem>>, %arg2: memref<8x128xf32, #tpu.memory_space<vmem>>) attributes {dimension_semantics = [#tpu.dimension_semantics<arbitrary>], iteration_bounds = array<i64: 1>, scalar_prefetch = 0 : i64, scratch_operands = 0 : i64, tpu.core_type = #tpu.core_type<tc>, window_params = [{pipeline_mode = #tpu.pipeline_mode<synchronous>, transform_indices = @transform_0, window_bounds = array<i64: 8, 128>}, {pipeline_mode = #tpu.pipeline_mode<synchronous>, transform_indices = @transform_1, window_bounds = array<i64: 8, 128>}]} {
    %c0 = arith.constant 0 : index
    %c0_0 = arith.constant 0 : index
    %0 = vector.load %arg1[%c0, %c0_0] : memref<8x128xf32, #tpu.memory_space<vmem>>, vector<8x128xf32>
    %c0_1 = arith.constant 0 : index
    %c0_2 = arith.constant 0 : index
    %1 = vector.load %arg2[%c0_1, %c0_2] : memref<8x128xf32, #tpu.memory_space<vmem>>, vector<8x128xf32>
    tpu.vector_store %arg2[%c0_1, %c0_2], %0 {strides = array<i32>} : memref<8x128xf32, #tpu.memory_space<vmem>>, vector<8x128xf32>,
    return
  }
  func.func @transform_0(%arg0: i32) -> (i32, i32) {
    %c0_i32 = arith.constant 0 : i32
    %c0_i32_0 = arith.constant 0 : i32
    %c0_i32_1 = arith.constant 0 : i32
    return %c0_i32, %c0_i32_0 : i32, i32
  }
  func.func @transform_1(%arg0: i32) -> (i32, i32) {
    %c0_i32 = arith.constant 0 : i32
    %c0_i32_0 = arith.constant 0 : i32
    %c0_i32_1 = arith.constant 0 : i32
    return %c0_i32, %c0_i32_0 : i32, i32
  }
}

module attributes {stable_mosaic.version = 11 : i64} {
  func.func @encoder_block_kernel(%arg0: i32, %arg1: memref<8x32xf32, #tpu.memory_space<vmem>>, %arg2: memref<32x96xbf16, #tpu.memory_space<vmem>>, %arg3: memref<1x96xf32, #tpu.memory_space<vmem>>, %arg4: memref<32x32xbf16, #tpu.memory_space<vmem>>, %arg5: memref<32x64xbf16, #tpu.memory_space<vmem>>, %arg6: memref<1x64xf32, #tpu.memory_space<vmem>>, %arg7: memref<64x32xbf16, #tpu.memory_space<vmem>>, %arg8: memref<6x32xf32, #tpu.memory_space<vmem>>, %arg9: memref<8x32xf32, #tpu.memory_space<vmem>>) attributes {dimension_semantics = [#tpu.dimension_semantics<parallel>], iteration_bounds = array<i64: 1>, scalar_prefetch = 0 : i64, scratch_operands = 0 : i64, tpu.core_type = #tpu.core_type<tc>, window_params = [{transform_indices = @transform_0, window_bounds = array<i64: 8, 32>}, {pipeline_mode = #tpu.pipeline_mode<synchronous>, transform_indices = @transform_1, window_bounds = array<i64: 32, 96>}, {pipeline_mode = #tpu.pipeline_mode<synchronous>, transform_indices = @transform_2, window_bounds = array<i64: 1, 96>}, {pipeline_mode = #tpu.pipeline_mode<synchronous>, transform_indices = @transform_3, window_bounds = array<i64: 32, 32>}, {pipeline_mode = #tpu.pipeline_mode<synchronous>, transform_indices = @transform_4, window_bounds = array<i64: 32, 64>}, {pipeline_mode = #tpu.pipeline_mode<synchronous>, transform_indices = @transform_5, window_bounds = array<i64: 1, 64>}, {pipeline_mode = #tpu.pipeline_mode<synchronous>, transform_indices = @transform_6, window_bounds = array<i64: 64, 32>}, {pipeline_mode = #tpu.pipeline_mode<synchronous>, transform_indices = @transform_7, window_bounds = array<i64: 6, 32>}, {transform_indices = @transform_8, window_bounds = array<i64: 8, 32>}]} {
    %c0 = arith.constant 0 : index
    %c0_0 = arith.constant 0 : index
    %0 = vector.load %arg1[%c0, %c0_0] : memref<8x32xf32, #tpu.memory_space<vmem>>, vector<8x32xf32>
    %1 = arith.truncf %0 : vector<8x32xf32> to vector<8x32xbf16>
    %c0_1 = arith.constant 0 : index
    %c0_2 = arith.constant 0 : index
    %2 = vector.load %arg2[%c0_1, %c0_2] : memref<32x96xbf16, #tpu.memory_space<vmem>>, vector<32x96xbf16>
    %cst = arith.constant dense<0.000000e+00> : vector<8x96xf32>
    %3 = tpu.matmul %1, %2, %cst {dimension_numbers = #tpu.dot_dimension_numbers<[1], [0], [0], [1], [0, 0, 1, 1], [], []>} : vector<8x32xbf16>, vector<32x96xbf16>, vector<8x96xf32> -> vector<8x96xf32>
    %c0_3 = arith.constant 0 : index
    %c0_4 = arith.constant 0 : index
    %4 = vector.load %arg3[%c0_3, %c0_4] : memref<1x96xf32, #tpu.memory_space<vmem>>, vector<1x96xf32>
    %5 = vector.broadcast %4 : vector<1x96xf32> to vector<8x96xf32>
    %6 = arith.addf %3, %5 : vector<8x96xf32>
    %7 = vector.extract_strided_slice %6 {offsets = [0, 0], sizes = [8, 32], strides = [1, 1]} : vector<8x96xf32> to vector<8x32xf32>
    %8 = vector.extract_strided_slice %6 {offsets = [0, 32], sizes = [8, 32], strides = [1, 1]} : vector<8x96xf32> to vector<8x32xf32>
    %9 = vector.extract_strided_slice %6 {offsets = [0, 64], sizes = [8, 32], strides = [1, 1]} : vector<8x96xf32> to vector<8x32xf32>
    %10 = vector.extract_strided_slice %7 {offsets = [0, 0], sizes = [8, 8], strides = [1, 1]} : vector<8x32xf32> to vector<8x8xf32>
    %11 = vector.extract_strided_slice %8 {offsets = [0, 0], sizes = [8, 8], strides = [1, 1]} : vector<8x32xf32> to vector<8x8xf32>
    %12 = arith.mulf %10, %11 : vector<8x8xf32>
    %cst_5 = arith.constant dense<0.000000e+00> : vector<8xf32>
    %13 = vector.multi_reduction <add>, %12, %cst_5 [1] : vector<8x8xf32> to vector<8xf32>
    %14 = vector.shape_cast %13 : vector<8xf32> to vector<8x1xf32>
    %15 = vector.extract_strided_slice %8 {offsets = [0, 8], sizes = [8, 8], strides = [1, 1]} : vector<8x32xf32> to vector<8x8xf32>
    %16 = arith.mulf %10, %15 : vector<8x8xf32>
    %cst_6 = arith.constant dense<0.000000e+00> : vector<8xf32>
    %17 = vector.multi_reduction <add>, %16, %cst_6 [1] : vector<8x8xf32> to vector<8xf32>
    %18 = vector.shape_cast %17 : vector<8xf32> to vector<8x1xf32>
    %19 = vector.extract_strided_slice %8 {offsets = [0, 16], sizes = [8, 8], strides = [1, 1]} : vector<8x32xf32> to vector<8x8xf32>
    %20 = arith.mulf %10, %19 : vector<8x8xf32>
    %cst_7 = arith.constant dense<0.000000e+00> : vector<8xf32>
    %21 = vector.multi_reduction <add>, %20, %cst_7 [1] : vector<8x8xf32> to vector<8xf32>
    %22 = vector.shape_cast %21 : vector<8xf32> to vector<8x1xf32>
    %23 = vector.extract_strided_slice %8 {offsets = [0, 24], sizes = [8, 8], strides = [1, 1]} : vector<8x32xf32> to vector<8x8xf32>
    %24 = arith.mulf %10, %23 : vector<8x8xf32>
    %cst_8 = arith.constant dense<0.000000e+00> : vector<8xf32>
    %25 = vector.multi_reduction <add>, %24, %cst_8 [1] : vector<8x8xf32> to vector<8xf32>
    %26 = vector.shape_cast %25 : vector<8xf32> to vector<8x1xf32>
    %27 = arith.maximumf %14, %18 : vector<8x1xf32>
    %28 = arith.maximumf %27, %22 : vector<8x1xf32>
    %29 = arith.maximumf %28, %26 : vector<8x1xf32>
    %30 = arith.subf %14, %29 : vector<8x1xf32>
    %31 = math.exp %30 : vector<8x1xf32>
    %32 = arith.subf %18, %29 : vector<8x1xf32>
    %33 = math.exp %32 : vector<8x1xf32>
    %34 = arith.subf %22, %29 : vector<8x1xf32>
    %35 = math.exp %34 : vector<8x1xf32>
    %36 = arith.subf %26, %29 : vector<8x1xf32>
    %37 = math.exp %36 : vector<8x1xf32>
    %38 = arith.addf %31, %33 : vector<8x1xf32>
    %39 = arith.addf %38, %35 : vector<8x1xf32>
    %40 = arith.addf %39, %37 : vector<8x1xf32>
    %41 = tpu.reciprocal %40 {approx = true} : vector<8x1xf32> -> vector<8x1xf32>
    %42 = arith.mulf %31, %41 : vector<8x1xf32>
    %43 = vector.extract_strided_slice %9 {offsets = [0, 0], sizes = [8, 8], strides = [1, 1]} : vector<8x32xf32> to vector<8x8xf32>
    %44 = vector.broadcast %42 : vector<8x1xf32> to vector<8x8xf32>
    %45 = arith.mulf %44, %43 : vector<8x8xf32>
    %46 = arith.mulf %33, %41 : vector<8x1xf32>
    %47 = vector.extract_strided_slice %9 {offsets = [0, 8], sizes = [8, 8], strides = [1, 1]} : vector<8x32xf32> to vector<8x8xf32>
    %48 = vector.broadcast %46 : vector<8x1xf32> to vector<8x8xf32>
    %49 = arith.mulf %48, %47 : vector<8x8xf32>
    %50 = arith.addf %45, %49 : vector<8x8xf32>
    %51 = arith.mulf %35, %41 : vector<8x1xf32>
    %52 = vector.extract_strided_slice %9 {offsets = [0, 16], sizes = [8, 8], strides = [1, 1]} : vector<8x32xf32> to vector<8x8xf32>
    %53 = vector.broadcast %51 : vector<8x1xf32> to vector<8x8xf32>
    %54 = arith.mulf %53, %52 : vector<8x8xf32>
    %55 = arith.addf %50, %54 : vector<8x8xf32>
    %56 = arith.mulf %37, %41 : vector<8x1xf32>
    %57 = vector.extract_strided_slice %9 {offsets = [0, 24], sizes = [8, 8], strides = [1, 1]} : vector<8x32xf32> to vector<8x8xf32>
    %58 = vector.broadcast %56 : vector<8x1xf32> to vector<8x8xf32>
    %59 = arith.mulf %58, %57 : vector<8x8xf32>
    %60 = arith.addf %55, %59 : vector<8x8xf32>
    %61 = vector.extract_strided_slice %7 {offsets = [0, 8], sizes = [8, 8], strides = [1, 1]} : vector<8x32xf32> to vector<8x8xf32>
    %62 = vector.extract_strided_slice %8 {offsets = [0, 0], sizes = [8, 8], strides = [1, 1]} : vector<8x32xf32> to vector<8x8xf32>
    %63 = arith.mulf %61, %62 : vector<8x8xf32>
    %cst_9 = arith.constant dense<0.000000e+00> : vector<8xf32>
    %64 = vector.multi_reduction <add>, %63, %cst_9 [1] : vector<8x8xf32> to vector<8xf32>
    %65 = vector.shape_cast %64 : vector<8xf32> to vector<8x1xf32>
    %66 = vector.extract_strided_slice %8 {offsets = [0, 8], sizes = [8, 8], strides = [1, 1]} : vector<8x32xf32> to vector<8x8xf32>
    %67 = arith.mulf %61, %66 : vector<8x8xf32>
    %cst_10 = arith.constant dense<0.000000e+00> : vector<8xf32>
    %68 = vector.multi_reduction <add>, %67, %cst_10 [1] : vector<8x8xf32> to vector<8xf32>
    %69 = vector.shape_cast %68 : vector<8xf32> to vector<8x1xf32>
    %70 = vector.extract_strided_slice %8 {offsets = [0, 16], sizes = [8, 8], strides = [1, 1]} : vector<8x32xf32> to vector<8x8xf32>
    %71 = arith.mulf %61, %70 : vector<8x8xf32>
    %cst_11 = arith.constant dense<0.000000e+00> : vector<8xf32>
    %72 = vector.multi_reduction <add>, %71, %cst_11 [1] : vector<8x8xf32> to vector<8xf32>
    %73 = vector.shape_cast %72 : vector<8xf32> to vector<8x1xf32>
    %74 = vector.extract_strided_slice %8 {offsets = [0, 24], sizes = [8, 8], strides = [1, 1]} : vector<8x32xf32> to vector<8x8xf32>
    %75 = arith.mulf %61, %74 : vector<8x8xf32>
    %cst_12 = arith.constant dense<0.000000e+00> : vector<8xf32>
    %76 = vector.multi_reduction <add>, %75, %cst_12 [1] : vector<8x8xf32> to vector<8xf32>
    %77 = vector.shape_cast %76 : vector<8xf32> to vector<8x1xf32>
    %78 = arith.maximumf %65, %69 : vector<8x1xf32>
    %79 = arith.maximumf %78, %73 : vector<8x1xf32>
    %80 = arith.maximumf %79, %77 : vector<8x1xf32>
    %81 = arith.subf %65, %80 : vector<8x1xf32>
    %82 = math.exp %81 : vector<8x1xf32>
    %83 = arith.subf %69, %80 : vector<8x1xf32>
    %84 = math.exp %83 : vector<8x1xf32>
    %85 = arith.subf %73, %80 : vector<8x1xf32>
    %86 = math.exp %85 : vector<8x1xf32>
    %87 = arith.subf %77, %80 : vector<8x1xf32>
    %88 = math.exp %87 : vector<8x1xf32>
    %89 = arith.addf %82, %84 : vector<8x1xf32>
    %90 = arith.addf %89, %86 : vector<8x1xf32>
    %91 = arith.addf %90, %88 : vector<8x1xf32>
    %92 = tpu.reciprocal %91 {approx = true} : vector<8x1xf32> -> vector<8x1xf32>
    %93 = arith.mulf %82, %92 : vector<8x1xf32>
    %94 = vector.extract_strided_slice %9 {offsets = [0, 0], sizes = [8, 8], strides = [1, 1]} : vector<8x32xf32> to vector<8x8xf32>
    %95 = vector.broadcast %93 : vector<8x1xf32> to vector<8x8xf32>
    %96 = arith.mulf %95, %94 : vector<8x8xf32>
    %97 = arith.mulf %84, %92 : vector<8x1xf32>
    %98 = vector.extract_strided_slice %9 {offsets = [0, 8], sizes = [8, 8], strides = [1, 1]} : vector<8x32xf32> to vector<8x8xf32>
    %99 = vector.broadcast %97 : vector<8x1xf32> to vector<8x8xf32>
    %100 = arith.mulf %99, %98 : vector<8x8xf32>
    %101 = arith.addf %96, %100 : vector<8x8xf32>
    %102 = arith.mulf %86, %92 : vector<8x1xf32>
    %103 = vector.extract_strided_slice %9 {offsets = [0, 16], sizes = [8, 8], strides = [1, 1]} : vector<8x32xf32> to vector<8x8xf32>
    %104 = vector.broadcast %102 : vector<8x1xf32> to vector<8x8xf32>
    %105 = arith.mulf %104, %103 : vector<8x8xf32>
    %106 = arith.addf %101, %105 : vector<8x8xf32>
    %107 = arith.mulf %88, %92 : vector<8x1xf32>
    %108 = vector.extract_strided_slice %9 {offsets = [0, 24], sizes = [8, 8], strides = [1, 1]} : vector<8x32xf32> to vector<8x8xf32>
    %109 = vector.broadcast %107 : vector<8x1xf32> to vector<8x8xf32>
    %110 = arith.mulf %109, %108 : vector<8x8xf32>
    %111 = arith.addf %106, %110 : vector<8x8xf32>
    %112 = vector.extract_strided_slice %7 {offsets = [0, 16], sizes = [8, 8], strides = [1, 1]} : vector<8x32xf32> to vector<8x8xf32>
    %113 = vector.extract_strided_slice %8 {offsets = [0, 0], sizes = [8, 8], strides = [1, 1]} : vector<8x32xf32> to vector<8x8xf32>
    %114 = arith.mulf %112, %113 : vector<8x8xf32>
    %cst_13 = arith.constant dense<0.000000e+00> : vector<8xf32>
    %115 = vector.multi_reduction <add>, %114, %cst_13 [1] : vector<8x8xf32> to vector<8xf32>
    %116 = vector.shape_cast %115 : vector<8xf32> to vector<8x1xf32>
    %117 = vector.extract_strided_slice %8 {offsets = [0, 8], sizes = [8, 8], strides = [1, 1]} : vector<8x32xf32> to vector<8x8xf32>
    %118 = arith.mulf %112, %117 : vector<8x8xf32>
    %cst_14 = arith.constant dense<0.000000e+00> : vector<8xf32>
    %119 = vector.multi_reduction <add>, %118, %cst_14 [1] : vector<8x8xf32> to vector<8xf32>
    %120 = vector.shape_cast %119 : vector<8xf32> to vector<8x1xf32>
    %121 = vector.extract_strided_slice %8 {offsets = [0, 16], sizes = [8, 8], strides = [1, 1]} : vector<8x32xf32> to vector<8x8xf32>
    %122 = arith.mulf %112, %121 : vector<8x8xf32>
    %cst_15 = arith.constant dense<0.000000e+00> : vector<8xf32>
    %123 = vector.multi_reduction <add>, %122, %cst_15 [1] : vector<8x8xf32> to vector<8xf32>
    %124 = vector.shape_cast %123 : vector<8xf32> to vector<8x1xf32>
    %125 = vector.extract_strided_slice %8 {offsets = [0, 24], sizes = [8, 8], strides = [1, 1]} : vector<8x32xf32> to vector<8x8xf32>
    %126 = arith.mulf %112, %125 : vector<8x8xf32>
    %cst_16 = arith.constant dense<0.000000e+00> : vector<8xf32>
    %127 = vector.multi_reduction <add>, %126, %cst_16 [1] : vector<8x8xf32> to vector<8xf32>
    %128 = vector.shape_cast %127 : vector<8xf32> to vector<8x1xf32>
    %129 = arith.maximumf %116, %120 : vector<8x1xf32>
    %130 = arith.maximumf %129, %124 : vector<8x1xf32>
    %131 = arith.maximumf %130, %128 : vector<8x1xf32>
    %132 = arith.subf %116, %131 : vector<8x1xf32>
    %133 = math.exp %132 : vector<8x1xf32>
    %134 = arith.subf %120, %131 : vector<8x1xf32>
    %135 = math.exp %134 : vector<8x1xf32>
    %136 = arith.subf %124, %131 : vector<8x1xf32>
    %137 = math.exp %136 : vector<8x1xf32>
    %138 = arith.subf %128, %131 : vector<8x1xf32>
    %139 = math.exp %138 : vector<8x1xf32>
    %140 = arith.addf %133, %135 : vector<8x1xf32>
    %141 = arith.addf %140, %137 : vector<8x1xf32>
    %142 = arith.addf %141, %139 : vector<8x1xf32>
    %143 = tpu.reciprocal %142 {approx = true} : vector<8x1xf32> -> vector<8x1xf32>
    %144 = arith.mulf %133, %143 : vector<8x1xf32>
    %145 = vector.extract_strided_slice %9 {offsets = [0, 0], sizes = [8, 8], strides = [1, 1]} : vector<8x32xf32> to vector<8x8xf32>
    %146 = vector.broadcast %144 : vector<8x1xf32> to vector<8x8xf32>
    %147 = arith.mulf %146, %145 : vector<8x8xf32>
    %148 = arith.mulf %135, %143 : vector<8x1xf32>
    %149 = vector.extract_strided_slice %9 {offsets = [0, 8], sizes = [8, 8], strides = [1, 1]} : vector<8x32xf32> to vector<8x8xf32>
    %150 = vector.broadcast %148 : vector<8x1xf32> to vector<8x8xf32>
    %151 = arith.mulf %150, %149 : vector<8x8xf32>
    %152 = arith.addf %147, %151 : vector<8x8xf32>
    %153 = arith.mulf %137, %143 : vector<8x1xf32>
    %154 = vector.extract_strided_slice %9 {offsets = [0, 16], sizes = [8, 8], strides = [1, 1]} : vector<8x32xf32> to vector<8x8xf32>
    %155 = vector.broadcast %153 : vector<8x1xf32> to vector<8x8xf32>
    %156 = arith.mulf %155, %154 : vector<8x8xf32>
    %157 = arith.addf %152, %156 : vector<8x8xf32>
    %158 = arith.mulf %139, %143 : vector<8x1xf32>
    %159 = vector.extract_strided_slice %9 {offsets = [0, 24], sizes = [8, 8], strides = [1, 1]} : vector<8x32xf32> to vector<8x8xf32>
    %160 = vector.broadcast %158 : vector<8x1xf32> to vector<8x8xf32>
    %161 = arith.mulf %160, %159 : vector<8x8xf32>
    %162 = arith.addf %157, %161 : vector<8x8xf32>
    %163 = vector.extract_strided_slice %7 {offsets = [0, 24], sizes = [8, 8], strides = [1, 1]} : vector<8x32xf32> to vector<8x8xf32>
    %164 = vector.extract_strided_slice %8 {offsets = [0, 0], sizes = [8, 8], strides = [1, 1]} : vector<8x32xf32> to vector<8x8xf32>
    %165 = arith.mulf %163, %164 : vector<8x8xf32>
    %cst_17 = arith.constant dense<0.000000e+00> : vector<8xf32>
    %166 = vector.multi_reduction <add>, %165, %cst_17 [1] : vector<8x8xf32> to vector<8xf32>
    %167 = vector.shape_cast %166 : vector<8xf32> to vector<8x1xf32>
    %168 = vector.extract_strided_slice %8 {offsets = [0, 8], sizes = [8, 8], strides = [1, 1]} : vector<8x32xf32> to vector<8x8xf32>
    %169 = arith.mulf %163, %168 : vector<8x8xf32>
    %cst_18 = arith.constant dense<0.000000e+00> : vector<8xf32>
    %170 = vector.multi_reduction <add>, %169, %cst_18 [1] : vector<8x8xf32> to vector<8xf32>
    %171 = vector.shape_cast %170 : vector<8xf32> to vector<8x1xf32>
    %172 = vector.extract_strided_slice %8 {offsets = [0, 16], sizes = [8, 8], strides = [1, 1]} : vector<8x32xf32> to vector<8x8xf32>
    %173 = arith.mulf %163, %172 : vector<8x8xf32>
    %cst_19 = arith.constant dense<0.000000e+00> : vector<8xf32>
    %174 = vector.multi_reduction <add>, %173, %cst_19 [1] : vector<8x8xf32> to vector<8xf32>
    %175 = vector.shape_cast %174 : vector<8xf32> to vector<8x1xf32>
    %176 = vector.extract_strided_slice %8 {offsets = [0, 24], sizes = [8, 8], strides = [1, 1]} : vector<8x32xf32> to vector<8x8xf32>
    %177 = arith.mulf %163, %176 : vector<8x8xf32>
    %cst_20 = arith.constant dense<0.000000e+00> : vector<8xf32>
    %178 = vector.multi_reduction <add>, %177, %cst_20 [1] : vector<8x8xf32> to vector<8xf32>
    %179 = vector.shape_cast %178 : vector<8xf32> to vector<8x1xf32>
    %180 = arith.maximumf %167, %171 : vector<8x1xf32>
    %181 = arith.maximumf %180, %175 : vector<8x1xf32>
    %182 = arith.maximumf %181, %179 : vector<8x1xf32>
    %183 = arith.subf %167, %182 : vector<8x1xf32>
    %184 = math.exp %183 : vector<8x1xf32>
    %185 = arith.subf %171, %182 : vector<8x1xf32>
    %186 = math.exp %185 : vector<8x1xf32>
    %187 = arith.subf %175, %182 : vector<8x1xf32>
    %188 = math.exp %187 : vector<8x1xf32>
    %189 = arith.subf %179, %182 : vector<8x1xf32>
    %190 = math.exp %189 : vector<8x1xf32>
    %191 = arith.addf %184, %186 : vector<8x1xf32>
    %192 = arith.addf %191, %188 : vector<8x1xf32>
    %193 = arith.addf %192, %190 : vector<8x1xf32>
    %194 = tpu.reciprocal %193 {approx = true} : vector<8x1xf32> -> vector<8x1xf32>
    %195 = arith.mulf %184, %194 : vector<8x1xf32>
    %196 = vector.extract_strided_slice %9 {offsets = [0, 0], sizes = [8, 8], strides = [1, 1]} : vector<8x32xf32> to vector<8x8xf32>
    %197 = vector.broadcast %195 : vector<8x1xf32> to vector<8x8xf32>
    %198 = arith.mulf %197, %196 : vector<8x8xf32>
    %199 = arith.mulf %186, %194 : vector<8x1xf32>
    %200 = vector.extract_strided_slice %9 {offsets = [0, 8], sizes = [8, 8], strides = [1, 1]} : vector<8x32xf32> to vector<8x8xf32>
    %201 = vector.broadcast %199 : vector<8x1xf32> to vector<8x8xf32>
    %202 = arith.mulf %201, %200 : vector<8x8xf32>
    %203 = arith.addf %198, %202 : vector<8x8xf32>
    %204 = arith.mulf %188, %194 : vector<8x1xf32>
    %205 = vector.extract_strided_slice %9 {offsets = [0, 16], sizes = [8, 8], strides = [1, 1]} : vector<8x32xf32> to vector<8x8xf32>
    %206 = vector.broadcast %204 : vector<8x1xf32> to vector<8x8xf32>
    %207 = arith.mulf %206, %205 : vector<8x8xf32>
    %208 = arith.addf %203, %207 : vector<8x8xf32>
    %209 = arith.mulf %190, %194 : vector<8x1xf32>
    %210 = vector.extract_strided_slice %9 {offsets = [0, 24], sizes = [8, 8], strides = [1, 1]} : vector<8x32xf32> to vector<8x8xf32>
    %211 = vector.broadcast %209 : vector<8x1xf32> to vector<8x8xf32>
    %212 = arith.mulf %211, %210 : vector<8x8xf32>
    %213 = arith.addf %208, %212 : vector<8x8xf32>
    %214 = tpu.concatenate %60, %111, %162, %213 in 1 : vector<8x8xf32>, vector<8x8xf32>, vector<8x8xf32>, vector<8x8xf32> -> vector<8x32xf32>
    %215 = arith.truncf %214 : vector<8x32xf32> to vector<8x32xbf16>
    %c0_21 = arith.constant 0 : index
    %c0_22 = arith.constant 0 : index
    %216 = vector.load %arg4[%c0_21, %c0_22] : memref<32x32xbf16, #tpu.memory_space<vmem>>, vector<32x32xbf16>
    %cst_23 = arith.constant dense<0.000000e+00> : vector<8x32xf32>
    %217 = tpu.matmul %215, %216, %cst_23 {dimension_numbers = #tpu.dot_dimension_numbers<[1], [0], [0], [1], [0, 0, 1, 1], [], []>} : vector<8x32xbf16>, vector<32x32xbf16>, vector<8x32xf32> -> vector<8x32xf32>
    %c0_24 = arith.constant 0 : index
    %c0_25 = arith.constant 0 : index
    %218 = vector.load %arg8[%c0_24, %c0_25] : memref<6x32xf32, #tpu.memory_space<vmem>>, vector<1x32xf32>
    %219 = vector.broadcast %218 : vector<1x32xf32> to vector<8x32xf32>
    %220 = arith.addf %217, %219 : vector<8x32xf32>
    %221 = arith.addf %0, %220 : vector<8x32xf32>
    %cst_26 = arith.constant dense<0.000000e+00> : vector<8xf32>
    %222 = vector.multi_reduction <add>, %221, %cst_26 [1] : vector<8x32xf32> to vector<8xf32>
    %223 = vector.shape_cast %222 : vector<8xf32> to vector<8x1xf32>
    %cst_27 = arith.constant 3.200000e+01 : f32
    %224 = vector.broadcast %cst_27 : f32 to vector<8x1xf32>
    %225 = arith.divf %223, %224 : vector<8x1xf32>
    %226 = arith.mulf %221, %221 : vector<8x32xf32>
    %cst_28 = arith.constant dense<0.000000e+00> : vector<8xf32>
    %227 = vector.multi_reduction <add>, %226, %cst_28 [1] : vector<8x32xf32> to vector<8xf32>
    %228 = vector.shape_cast %227 : vector<8xf32> to vector<8x1xf32>
    %cst_29 = arith.constant 3.200000e+01 : f32
    %229 = vector.broadcast %cst_29 : f32 to vector<8x1xf32>
    %230 = arith.divf %228, %229 : vector<8x1xf32>
    %231 = arith.mulf %225, %225 : vector<8x1xf32>
    %232 = arith.subf %230, %231 : vector<8x1xf32>
    %233 = vector.broadcast %225 : vector<8x1xf32> to vector<8x32xf32>
    %234 = arith.subf %221, %233 : vector<8x32xf32>
    %cst_30 = arith.constant 9.99999974E-6 : f32
    %235 = vector.broadcast %cst_30 : f32 to vector<8x1xf32>
    %236 = arith.addf %232, %235 : vector<8x1xf32>
    %237 = math.rsqrt %236 : vector<8x1xf32>
    %238 = vector.broadcast %237 : vector<8x1xf32> to vector<8x32xf32>
    %239 = arith.mulf %234, %238 : vector<8x32xf32>
    %c1 = arith.constant 1 : index
    %c0_31 = arith.constant 0 : index
    %240 = vector.load %arg8[%c1, %c0_31] : memref<6x32xf32, #tpu.memory_space<vmem>>, vector<1x32xf32>
    %241 = vector.broadcast %240 : vector<1x32xf32> to vector<8x32xf32>
    %242 = arith.mulf %239, %241 : vector<8x32xf32>
    %c2 = arith.constant 2 : index
    %c0_32 = arith.constant 0 : index
    %243 = vector.load %arg8[%c2, %c0_32] : memref<6x32xf32, #tpu.memory_space<vmem>>, vector<1x32xf32>
    %244 = vector.broadcast %243 : vector<1x32xf32> to vector<8x32xf32>
    %245 = arith.addf %242, %244 : vector<8x32xf32>
    %246 = arith.truncf %245 : vector<8x32xf32> to vector<8x32xbf16>
    %c0_33 = arith.constant 0 : index
    %c0_34 = arith.constant 0 : index
    %247 = vector.load %arg5[%c0_33, %c0_34] : memref<32x64xbf16, #tpu.memory_space<vmem>>, vector<32x64xbf16>
    %cst_35 = arith.constant dense<0.000000e+00> : vector<8x64xf32>
    %248 = tpu.matmul %246, %247, %cst_35 {dimension_numbers = #tpu.dot_dimension_numbers<[1], [0], [0], [1], [0, 0, 1, 1], [], []>} : vector<8x32xbf16>, vector<32x64xbf16>, vector<8x64xf32> -> vector<8x64xf32>
    %c0_36 = arith.constant 0 : index
    %c0_37 = arith.constant 0 : index
    %249 = vector.load %arg6[%c0_36, %c0_37] : memref<1x64xf32, #tpu.memory_space<vmem>>, vector<1x64xf32>
    %250 = vector.broadcast %249 : vector<1x64xf32> to vector<8x64xf32>
    %251 = arith.addf %248, %250 : vector<8x64xf32>
    %cst_38 = arith.constant 0.000000e+00 : f32
    %252 = vector.broadcast %cst_38 : f32 to vector<8x64xf32>
    %253 = arith.maximumf %251, %252 : vector<8x64xf32>
    %254 = arith.truncf %253 : vector<8x64xf32> to vector<8x64xbf16>
    %c0_39 = arith.constant 0 : index
    %c0_40 = arith.constant 0 : index
    %255 = vector.load %arg7[%c0_39, %c0_40] : memref<64x32xbf16, #tpu.memory_space<vmem>>, vector<64x32xbf16>
    %cst_41 = arith.constant dense<0.000000e+00> : vector<8x32xf32>
    %256 = tpu.matmul %254, %255, %cst_41 {dimension_numbers = #tpu.dot_dimension_numbers<[1], [0], [0], [1], [0, 0, 1, 1], [], []>} : vector<8x64xbf16>, vector<64x32xbf16>, vector<8x32xf32> -> vector<8x32xf32>
    %c3 = arith.constant 3 : index
    %c0_42 = arith.constant 0 : index
    %257 = vector.load %arg8[%c3, %c0_42] : memref<6x32xf32, #tpu.memory_space<vmem>>, vector<1x32xf32>
    %258 = vector.broadcast %257 : vector<1x32xf32> to vector<8x32xf32>
    %259 = arith.addf %256, %258 : vector<8x32xf32>
    %260 = arith.addf %245, %259 : vector<8x32xf32>
    %cst_43 = arith.constant dense<0.000000e+00> : vector<8xf32>
    %261 = vector.multi_reduction <add>, %260, %cst_43 [1] : vector<8x32xf32> to vector<8xf32>
    %262 = vector.shape_cast %261 : vector<8xf32> to vector<8x1xf32>
    %cst_44 = arith.constant 3.200000e+01 : f32
    %263 = vector.broadcast %cst_44 : f32 to vector<8x1xf32>
    %264 = arith.divf %262, %263 : vector<8x1xf32>
    %265 = arith.mulf %260, %260 : vector<8x32xf32>
    %cst_45 = arith.constant dense<0.000000e+00> : vector<8xf32>
    %266 = vector.multi_reduction <add>, %265, %cst_45 [1] : vector<8x32xf32> to vector<8xf32>
    %267 = vector.shape_cast %266 : vector<8xf32> to vector<8x1xf32>
    %cst_46 = arith.constant 3.200000e+01 : f32
    %268 = vector.broadcast %cst_46 : f32 to vector<8x1xf32>
    %269 = arith.divf %267, %268 : vector<8x1xf32>
    %270 = arith.mulf %264, %264 : vector<8x1xf32>
    %271 = arith.subf %269, %270 : vector<8x1xf32>
    %272 = vector.broadcast %264 : vector<8x1xf32> to vector<8x32xf32>
    %273 = arith.subf %260, %272 : vector<8x32xf32>
    %cst_47 = arith.constant 9.99999974E-6 : f32
    %274 = vector.broadcast %cst_47 : f32 to vector<8x1xf32>
    %275 = arith.addf %271, %274 : vector<8x1xf32>
    %276 = math.rsqrt %275 : vector<8x1xf32>
    %277 = vector.broadcast %276 : vector<8x1xf32> to vector<8x32xf32>
    %278 = arith.mulf %273, %277 : vector<8x32xf32>
    %c4 = arith.constant 4 : index
    %c0_48 = arith.constant 0 : index
    %279 = vector.load %arg8[%c4, %c0_48] : memref<6x32xf32, #tpu.memory_space<vmem>>, vector<1x32xf32>
    %280 = vector.broadcast %279 : vector<1x32xf32> to vector<8x32xf32>
    %281 = arith.mulf %278, %280 : vector<8x32xf32>
    %c5 = arith.constant 5 : index
    %c0_49 = arith.constant 0 : index
    %282 = vector.load %arg8[%c5, %c0_49] : memref<6x32xf32, #tpu.memory_space<vmem>>, vector<1x32xf32>
    %283 = vector.broadcast %282 : vector<1x32xf32> to vector<8x32xf32>
    %284 = arith.addf %281, %283 : vector<8x32xf32>
    %c0_50 = arith.constant 0 : index
    %c0_51 = arith.constant 0 : index
    %285 = vector.load %arg9[%c0_50, %c0_51] : memref<8x32xf32, #tpu.memory_space<vmem>>, vector<8x32xf32>
    tpu.vector_store %arg9[%c0_50, %c0_51], %284 {strides = array<i32>} : memref<8x32xf32, #tpu.memory_space<vmem>>, vector<8x32xf32>,
    return
  }
  func.func @transform_0(%arg0: i32) -> (i32, i32) {
    %c0_i32 = arith.constant 0 : i32
    %c0_i32_0 = arith.constant 0 : i32
    return %arg0, %c0_i32 : i32, i32
  }
  func.func @transform_1(%arg0: i32) -> (i32, i32) {
    %c0_i32 = arith.constant 0 : i32
    %c0_i32_0 = arith.constant 0 : i32
    %c0_i32_1 = arith.constant 0 : i32
    return %c0_i32, %c0_i32_0 : i32, i32
  }
  func.func @transform_2(%arg0: i32) -> (i32, i32) {
    %c0_i32 = arith.constant 0 : i32
    %c0_i32_0 = arith.constant 0 : i32
    %c0_i32_1 = arith.constant 0 : i32
    return %c0_i32, %c0_i32_0 : i32, i32
  }
  func.func @transform_3(%arg0: i32) -> (i32, i32) {
    %c0_i32 = arith.constant 0 : i32
    %c0_i32_0 = arith.constant 0 : i32
    %c0_i32_1 = arith.constant 0 : i32
    return %c0_i32, %c0_i32_0 : i32, i32
  }
  func.func @transform_4(%arg0: i32) -> (i32, i32) {
    %c0_i32 = arith.constant 0 : i32
    %c0_i32_0 = arith.constant 0 : i32
    %c0_i32_1 = arith.constant 0 : i32
    return %c0_i32, %c0_i32_0 : i32, i32
  }
  func.func @transform_5(%arg0: i32) -> (i32, i32) {
    %c0_i32 = arith.constant 0 : i32
    %c0_i32_0 = arith.constant 0 : i32
    %c0_i32_1 = arith.constant 0 : i32
    return %c0_i32, %c0_i32_0 : i32, i32
  }
  func.func @transform_6(%arg0: i32) -> (i32, i32) {
    %c0_i32 = arith.constant 0 : i32
    %c0_i32_0 = arith.constant 0 : i32
    %c0_i32_1 = arith.constant 0 : i32
    return %c0_i32, %c0_i32_0 : i32, i32
  }
  func.func @transform_7(%arg0: i32) -> (i32, i32) {
    %c0_i32 = arith.constant 0 : i32
    %c0_i32_0 = arith.constant 0 : i32
    %c0_i32_1 = arith.constant 0 : i32
    return %c0_i32, %c0_i32_0 : i32, i32
  }
  func.func @transform_8(%arg0: i32) -> (i32, i32) {
    %c0_i32 = arith.constant 0 : i32
    %c0_i32_0 = arith.constant 0 : i32
    return %arg0, %c0_i32 : i32, i32
  }
}

</mosaic_0001>

<bundles_post_ra>
// kernel: tpu_custom_call.1
= control target key start
LH: loop header
LB: loop body
LE: loop exit
PB: predicated region body
PF: predicated region fallthrough
CT: control target
= control target key end

     0   :  { %6 = vsyncpa [#allocation3], 0  ;;  %s102_s0 = inlined_call_operand.hbm [shape: f32[8,128], index: 0, kind: input, shape index: {}]   ;;  %s103_s1 = inlined_call_operand.hbm [shape: f32[8,128], index: 1, kind: output, shape index: {}]  }
   0x1   :  { %7 = vsyncpa [#allocation4], 0  ;;  %s84_s6 = smov [#allocation2]  }
   0x2   :  { %s14_s7 = sshll.u32 %s84_s6, 4  ;;  %s15_s7 = int_to_ptr.vmem [resolvable:$true] %s14_s7 }
   0x3   :  { %s48_s8 = scalar_lea.vmem %s15_s7, 128  ;;  %p53_p1 = scmp.lt.s32.totalorder %s15_s7, %s15_s7 }
   0x4   :  { %p49_p0 = scmp.ne.s32.totalorder %s15_s7, %s48_s8  ;;  %p54_p2 = scmp.lt.s32.totalorder %s48_s8, %s48_s8 }
   0x6   :  { %p55_p3 = por %p54_p2, %p53_p1 }
   0x8   :  { %p56_p4 = pnand %p55_p3, %p49_p0 }
   0xa   :  { %59 = shalt.err (!%p56_p4)
}
   0xb   :  { %17 = dma.hbm_to_vmem [thread:$0]  %s102_s0, 128, %s15_s7, [#allocation3]  }
   0xc   :  { %80 = dma.done.wait [#allocation3], 128  }
   0xd   :  { %81 = vsyncadd [#allocation3], 4294967168  ;;  %s85_s11 = smov [#allocation5]   ;;  %v21_v0 = vld [vmem:[#allocation2] sm:$0xff] }
   0xe   :  { %s29_s12 = sshll.u32 %s85_s11, 4  ;;  %22 = vst [vmem:[#allocation5] sm:$0xff] %v21_v0  ;;  %s30_s12 = int_to_ptr.vmem [resolvable:$true] %s29_s12 }
   0xf   :  { %s60_s13 = scalar_lea.vmem %s30_s12, 128  ;;  %p65_p6 = scmp.lt.s32.totalorder %s30_s12, %s30_s12 }
  0x10   :  { %p61_p5 = scmp.ne.s32.totalorder %s30_s12, %s60_s13  ;;  %p66_p7 = scmp.lt.s32.totalorder %s60_s13, %s60_s13 }
  0x12   :  { %p67_p8 = por %p66_p7, %p65_p6 }
  0x14   :  { %p68_p9 = pnand %p67_p8, %p61_p5 }
  0x16   :  { %71 = shalt.err (!%p68_p9)
}
  0x17   :  { %32 = dma.vmem_to_hbm [thread:$0]  %s30_s12, 128, %s103_s1, [#allocation4]  }
  0x18   :  { %82 = dma.done.wait [#allocation4], 128  }
  0x19   :  { %83 = vsyncadd [#allocation4], 4294967168 }
  0x1a   :  { %36 = vsyncpa [#allocation3], 1 }
  0x1b   :  { %37 = vsyncpa [#allocation4], 1 }

// kernel: tpu_custom_call.1
= control target key start
LH: loop header
LB: loop body
LE: loop exit
PB: predicated region body
PF: predicated region fallthrough
CT: control target
= control target key end

     0   :  { %13 = vsyncpa [#allocation3], 0  ;;  %s1161_s0 = inlined_call_operand.hbm [shape: f32[8,32], index: 0, kind: input, shape index: {}]   ;;  %s1162_s1 = inlined_call_operand.vmem [shape: bf16[32,96], index: 1, kind: input, shape index: {}]   ;;  %s1163_s2 = inlined_call_operand.vmem [shape: f32[1,96], index: 2, kind: input, shape index: {}]   ;;  %s1164_s3 = inlined_call_operand.vmem [shape: bf16[32,32], index: 3, kind: input, shape index: {}]   ;;  %s1165_s4 = inlined_call_operand.vmem [shape: bf16[32,64], index: 4, kind: input, shape index: {}]   ;;  %s1166_s5 = inlined_call_operand.hbm [shape: f32[1,64], index: 5, kind: input, shape index: {}]   ;;  %s1167_s6 = inlined_call_operand.vmem [shape: bf16[64,32], index: 6, kind: input, shape index: {}]   ;;  %s1168_s7 = inlined_call_operand.vmem [shape: f32[6,32], index: 7, kind: input, shape index: {}]   ;;  %s1169_s8 = inlined_call_operand.hbm [shape: f32[8,32], index: 8, kind: output, shape index: {}]  }
   0x1   :  { %14 = vsyncpa [#allocation6], 0 }
   0x2   :  { %15 = vsyncpa [#allocation4], 0  ;;  %s927_s27 = smov [#allocation2]   ;;  %s928_s29 = smov [#allocation5]  }
   0x3   :  { %s22_s28 = sshll.u32 %s927_s27, 4  ;;  %s40_s30 = sshll.u32 %s928_s29, 4  ;;  %s23_s28 = int_to_ptr.vmem [resolvable:$true] %s22_s28  ;;  %s41_s30 = int_to_ptr.vmem [resolvable:$true] %s40_s30 }
   0x4   :  { %s869_s9 = scalar_lea.vmem %s23_s28, 128  ;;  %p874_p1 = scmp.lt.s32.totalorder %s23_s28, %s23_s28 }
   0x5   :  { %p870_p0 = scmp.ne.s32.totalorder %s23_s28, %s869_s9  ;;  %p875_p2 = scmp.lt.s32.totalorder %s869_s9, %s869_s9 }
   0x7   :  { %p876_p3 = por %p875_p2, %p874_p1 }
   0x9   :  { %p877_p4 = pnand %p876_p3, %p870_p0 }
   0xb   :  { %880 = shalt.err (!%p877_p4)
}
   0xc   :  { %25 = dma.hbm_to_vmem [thread:$0]  %s1161_s0, 128, %s23_s28, [#allocation3]  }
   0xd   :  { %s889_s12 = scalar_lea.vmem %s41_s30, 16  ;;  %s893_s13 = scalar_lea.vmem %s41_s30, 32 }
   0xe   :  { %p890_p5 = scmp.ne.s32.totalorder %s41_s30, %s889_s12  ;;  %p894_p6 = scmp.lt.s32.totalorder %s41_s30, %s41_s30 }
   0xf   :  { %p895_p7 = scmp.lt.s32.totalorder %s893_s13, %s889_s12 }
  0x11   :  { %p896_p8 = por %p895_p7, %p894_p6 }
  0x13   :  { %p897_p9 = pnand %p896_p8, %p890_p5 }
  0x15   :  { %900 = shalt.err (!%p897_p9)
}
  0x16   :  { %43 = dma.hbm_to_vmem [thread:$0]  %s1166_s5, 16, %s41_s30, [#allocation6]  }
  0x17   :  { %921 = dma.done.wait [#allocation3], 128  }
  0x18   :  { %922 = vsyncadd [#allocation3], 4294967168 }
  0x19   :  { %923 = dma.done.wait [#allocation6], 16  }
  0x1a   :  { %924 = vsyncadd [#allocation6], 4294967280  ;;  %v929_v0 = vmov 0.0   ;;  %vm930_vm0 = vmmov 0   ;;  %v807_v1 = vld [vmem:[%s1162_s1 + $0x8] sm:$0xff]   ;;  %v808_v2 = vld [vmem:[%s1162_s1] sm:$0xff]  }
  0x1b   :  { %758 = vmatprep.subr.bf16.mxu0 %v929_v0  ;;  %762 = vmatprep.mubr.msk.bf16.mxu0 %vm930_vm0, %v929_v0  ;;  %v1003_v3 = vld [vmem:[#allocation2] sm:$0xff]  ;;  %vm80_vm1 = vcmask 261120   ;;  %s931_s1 = smov 112   ;;  %s932_s20 = smov 96   ;;  %vm129_vm2 = vcmask 64512   ;;  %vm429_vm3 = vcmask 130048  }
  0x1c   :  { %766 = vmatprep.subr.bf16.mxu1 %v929_v0  ;;  %770 = vmatprep.mubr.msk.bf16.mxu1 %vm930_vm0, %v929_v0  ;;  %v56_v4 = vpack.c.bf16 %v1003_v3, %v1003_v3  ;;  %v722_v5 = vld [vmem:[%s1163_s2] ss:$0 sm:$0xff]  ;;  %s933_s21 = smov 88   ;;  %s934_s22 = smov 104   ;;  %vm431_vm4 = vcmask 195584   ;;  %vm633_vm5 = vcmask 523264  }
  0x1d   :  { %759 = vmatpush3.bf16.msra.mxu0 %v807_v1  ;;  %s935_s2 = smov 80   ;;  %s936_s23 = smov 120  }
  0x1e   :  { %760 = vmatprep.subr.bf16.mxu0 %v929_v0  ;;  %s937_s24 = smov 72   ;;  %s938_s25 = smov 64  }
  0x21   :  { %761 = vmatpush3.bf16.msra.mxu0 %v808_v2 }
  0x22   :  { %774 = vmatprep.subr.bf16.mxu0 %v929_v0 }
  0x24   :  { %763 = vmatmul.mubr.msk.bf16.vlgmr.msra.gmra.mxu0 %vm80_vm1, %v56_v4 }
  0x25   :  { %778 = vmatprep.mubr.msk.bf16.mxu0 %vm930_vm0, %v929_v0 }
  0xe4   :  { %v118_v6 = vpop.f32.mrf.mxu0 }
  0xe5   :  { %v1015_v7 = vadd.f32 %v722_v5, %v118_v6 }
  0xe6   :  { %v764_v8 = vpop.f32.mrf.mxu0 }
  0xe7   :  { %270 = vrot.lane.b32.xlu1 %v1015_v7, %s931_s1  ;;  %125 = vrot.lane.b32.xlu0 %v1015_v7, %s932_s20 }
  0xe8   :  { %v121_v9 = vpop.f32.mrf.mxu0 }
  0xea   :  { %v765_v10 = vpop.f32.mrf.mxu0 }
  0xeb   :  { %133 = vrot.lane.b32.xlu1 %v1015_v7, %s933_s21  ;;  %196 = vrot.lane.b32.xlu0 %v1015_v7, %s934_s22 }
  0xef   :  { %140 = vrot.lane.b32.xlu1 %v1015_v7, %s935_s2  ;;  %341 = vrot.lane.b32.xlu0 %v1015_v7, %s936_s23 }
  0xf3   :  { %147 = vrot.lane.b32.xlu0 %v1015_v7, %s937_s24 }
 0x159   :  { %v271_v11 = vpop.permute.xlu1 %270  ;;  %v126_v12 = vpop.permute.xlu0 %125 }
 0x15a   :  { %v128_v13 = vmul.f32 %v126_v12, %v1015_v7  ;;  %v273_v17 = vmul.f32 %v271_v11, %v1015_v7 }
 0x15c   :  { %208 = vrot.lane.b32.xlu1 %v128_v13, %s936_s23  ;;  %v130_v26 = vsel %vm129_vm2, %v128_v13, 0.0 }
 0x15d   :  { %v197_v14 = vpop.permute.xlu0 %196  ;;  %v134_v16 = vpop.permute.xlu1 %133 }
 0x15e   :  { %v199_v15 = vmul.f32 %v197_v14, %v1015_v7  ;;  %v136_v18 = vmul.f32 %v134_v16, %v1015_v7 }
 0x160   :  { %281 = vrot.lane.b32.xlu1 %v199_v15, %s931_s1  ;;  %201 = vrot.lane.b32.xlu0 %v199_v15, %s936_s23  ;;  %v137_v24 = vsel %vm129_vm2, %v136_v18, 0.0 }
 0x161   :  { %v342_v19 = vpop.permute.xlu0 %341  ;;  %v141_v21 = vpop.permute.xlu1 %140 }
 0x162   :  { %v344_v20 = vmul.f32 %v342_v19, %v1015_v7  ;;  %v143_v22 = vmul.f32 %v141_v21, %v1015_v7 }
 0x164   :  { %215 = vrot.lane.b32.xlu1 %v136_v18, %s936_s23  ;;  %275 = vrot.lane.b32.xlu0 %v273_v17, %s931_s1  ;;  %v144_v27 = vsel %vm129_vm2, %v143_v22, 0.0 }
 0x165   :  { %v148_v23 = vpop.permute.xlu0 %147 }
 0x166   :  { %v150_v25 = vmul.f32 %v148_v23, %v1015_v7 }
 0x168   :  { %352 = vrot.lane.b32.xlu1 %v273_v17, %s934_s22  ;;  %346 = vrot.lane.b32.xlu0 %v344_v20, %s934_s22  ;;  %v151_v28 = vsel %vm129_vm2, %v150_v25, 0.0 }
 0x16c   :  { %222 = vrot.lane.b32.xlu1 %v143_v22, %s936_s23  ;;  %287 = vrot.lane.b32.xlu0 %v128_v13, %s931_s1 }
 0x170   :  { %293 = vrot.lane.b32.xlu1 %v136_v18, %s931_s1  ;;  %358 = vrot.lane.b32.xlu0 %v199_v15, %s934_s22 }
 0x174   :  { %364 = vrot.lane.b32.xlu0 %v128_v13, %s934_s22 }
 0x193   :  { %138 = vadd.xlane.f32.xlu0 %v137_v24 }
 0x194   :  { %131 = vadd.xlane.f32.xlu1 %v130_v26 }
 0x197   :  { %145 = vadd.xlane.f32.xlu0 %v144_v27 }
 0x198   :  { %152 = vadd.xlane.f32.xlu1 %v151_v28 }
 0x1ce   :  { %v209_v29 = vpop.permute.xlu1 %208 }
 0x1cf   :  { %v211_v30 = vsel %vm129_vm2, %v209_v29, 0.0 }
 0x1d0   :  { %212 = vadd.xlane.f32.xlu1 %v211_v30 }
 0x1d2   :  { %v282_v31 = vpop.permute.xlu1 %281  ;;  %v202_v32 = vpop.permute.xlu0 %201 }
 0x1d3   :  { %v284_v33 = vsel %vm129_vm2, %v282_v31, 0.0  ;;  %v204_v34 = vsel %vm129_vm2, %v202_v32, 0.0 }
 0x1d4   :  { %285 = vadd.xlane.f32.xlu1 %v284_v33  ;;  %205 = vadd.xlane.f32.xlu0 %v204_v34 }
 0x1d6   :  { %v216_v35 = vpop.permute.xlu1 %215  ;;  %v276_v36 = vpop.permute.xlu0 %275 }
 0x1d7   :  { %v218_v37 = vsel %vm129_vm2, %v216_v35, 0.0  ;;  %v278_v38 = vsel %vm129_vm2, %v276_v36, 0.0 }
 0x1d8   :  { %219 = vadd.xlane.f32.xlu1 %v218_v37  ;;  %279 = vadd.xlane.f32.xlu0 %v278_v38 }
 0x1da   :  { %v353_v39 = vpop.permute.xlu1 %352  ;;  %v347_v40 = vpop.permute.xlu0 %346 }
 0x1db   :  { %v355_v41 = vsel %vm129_vm2, %v353_v39, 0.0  ;;  %v349_v42 = vsel %vm129_vm2, %v347_v40, 0.0 }
 0x1dc   :  { %356 = vadd.xlane.f32.xlu1 %v355_v41  ;;  %350 = vadd.xlane.f32.xlu0 %v349_v42 }
 0x1de   :  { %v223_v43 = vpop.permute.xlu1 %222  ;;  %v288_v44 = vpop.permute.xlu0 %287 }
 0x1df   :  { %v290_v45 = vsel %vm129_vm2, %v288_v44, 0.0  ;;  %v225_v47 = vsel %vm129_vm2, %v223_v43, 0.0 }
 0x1e0   :  { %291 = vadd.xlane.f32.xlu0 %v290_v45 }
 0x1e2   :  { %v359_v46 = vpop.permute.xlu0 %358  ;;  %v294_v49 = vpop.permute.xlu1 %293 }
 0x1e3   :  { %v361_v48 = vsel %vm129_vm2, %v359_v46, 0.0  ;;  %v296_v51 = vsel %vm129_vm2, %v294_v49, 0.0 }
 0x1e4   :  { %226 = vadd.xlane.f32.xlu0 %v225_v47  ;;  %362 = vadd.xlane.f32.xlu1 %v361_v48 }
 0x1e6   :  { %v365_v50 = vpop.permute.xlu0 %364 }
 0x1e7   :  { %v367_v52 = vsel %vm129_vm2, %v365_v50, 0.0 }
 0x1e8   :  { %297 = vadd.xlane.f32.xlu0 %v296_v51  ;;  %368 = vadd.xlane.f32.xlu1 %v367_v52 }
 0x21c   :  { %v139_v53 = vpop.xlane.xlu0 %138 }
 0x21d   :  { %v132_v54 = vpop.xlane.xlu1 %131 }
 0x21e   :  { %v154_v55 = vmax.f32 %v132_v54, %v139_v53 }
 0x220   :  { %v146_v56 = vpop.xlane.xlu0 %145 }
 0x221   :  { %v155_v57 = vmax.f32 %v154_v55, %v146_v56  ;;  %v153_v58 = vpop.xlane.xlu1 %152 }
 0x223   :  { %v156_v59 = vmax.f32 %v155_v57, %v153_v58 }
 0x225   :  { %v157_v60 = vsub.f32 %v132_v54, %v156_v59  ;;  %v160_v61 = vsub.f32 %v139_v53, %v156_v59  ;;  %v163_v62 = vsub.f32 %v146_v56, %v156_v59  ;;  %v166_v63 = vsub.f32 %v153_v58, %v156_v59 }
 0x227   :  { %v158_v1 = vmul.f32 1.442695, %v157_v60  ;;  %v161_v2 = vmul.f32 1.442695, %v160_v61  ;;  %v164_v4 = vmul.f32 1.442695, %v163_v62 }
 0x228   :  { %v167_v5 = vmul.f32 1.442695, %v166_v63 }
 0x229   :  { %817 = vpow2.f32 %v158_v1 }
 0x22a   :  { %819 = vpow2.f32 %v161_v2 }
 0x22b   :  { %821 = vpow2.f32 %v164_v4 }
 0x22c   :  { %823 = vpow2.f32 %v167_v5 }
 0x236   :  { %v818_v6 = vpop.eup %817 }
 0x237   :  { %v820_v8 = vpop.eup %819 }
 0x238   :  { %v169_v9 = vadd.f32 %v820_v8, %v818_v6  ;;  %v822_v10 = vpop.eup %821 }
 0x239   :  { %v824_v12 = vpop.eup %823 }
 0x23a   :  { %v170_v11 = vadd.f32 %v822_v10, %v169_v9 }
 0x23c   :  { %v171_v13 = vadd.f32 %v824_v12, %v170_v11 }
 0x23e   :  { %825 = vrcp.f32 %v171_v13 }
 0x24b   :  { %v826_v14 = vpop.eup %825 }
 0x24c   :  { %v175_v15 = vmul.f32 %v826_v14, %v820_v8  ;;  %v1065_v16 = vmul.f32 %v826_v14, %v818_v6  ;;  %v182_v18 = vmul.f32 %v826_v14, %v822_v10  ;;  %v189_v20 = vmul.f32 %v826_v14, %v824_v12 }
 0x24e   :  { %v176_v17 = vmul.f32 %v175_v15, %v1015_v7  ;;  %v183_v19 = vmul.f32 %v182_v18, %v1015_v7  ;;  %v190_v21 = vmul.f32 %v189_v20, %v1015_v7 }
 0x250   :  { %178 = vrot.lane.b32.xlu0 %v176_v17, %s936_s23 }
 0x254   :  { %185 = vrot.lane.b32.xlu0 %v183_v19, %s931_s1 }
 0x258   :  { %192 = vrot.lane.b32.xlu0 %v190_v21, %s934_s22 }
 0x259   :  { %v213_v22 = vpop.xlane.xlu1 %212 }
 0x25d   :  { %v286_v23 = vpop.xlane.xlu1 %285  ;;  %v206_v24 = vpop.xlane.xlu0 %205 }
 0x25e   :  { %v228_v30 = vmax.f32 %v206_v24, %v213_v22 }
 0x261   :  { %v280_v25 = vpop.xlane.xlu0 %279  ;;  %v220_v26 = vpop.xlane.xlu1 %219 }
 0x262   :  { %v229_v31 = vmax.f32 %v228_v30, %v220_v26  ;;  %v299_v36 = vmax.f32 %v280_v25, %v286_v23 }
 0x265   :  { %v351_v27 = vpop.xlane.xlu0 %350  ;;  %v357_v28 = vpop.xlane.xlu1 %356 }
 0x266   :  { %v370_v32 = vmax.f32 %v351_v27, %v357_v28 }
 0x269   :  { %v292_v29 = vpop.xlane.xlu0 %291 }
 0x26a   :  { %v300_v42 = vmax.f32 %v299_v36, %v292_v29 }
 0x26d   :  { %v363_v33 = vpop.xlane.xlu1 %362  ;;  %v227_v34 = vpop.xlane.xlu0 %226 }
 0x26e   :  { %v230_v35 = vmax.f32 %v229_v31, %v227_v34  ;;  %v371_v37 = vmax.f32 %v370_v32, %v363_v33 }
 0x270   :  { %v231_v38 = vsub.f32 %v206_v24, %v230_v35  ;;  %v234_v39 = vsub.f32 %v213_v22, %v230_v35  ;;  %v237_v40 = vsub.f32 %v220_v26, %v230_v35  ;;  %v240_v41 = vsub.f32 %v227_v34, %v230_v35 }
 0x271   :  { %v369_v43 = vpop.xlane.xlu1 %368  ;;  %v298_v44 = vpop.xlane.xlu0 %297 }
 0x272   :  { %v232_v45 = vmul.f32 1.442695, %v231_v38  ;;  %v235_v46 = vmul.f32 1.442695, %v234_v39  ;;  %v238_v47 = vmul.f32 1.442695, %v237_v40  ;;  %v372_v48 = vmax.f32 %v371_v37, %v369_v43 }
 0x273   :  { %v241_v49 = vmul.f32 1.442695, %v240_v41  ;;  %v301_v50 = vmax.f32 %v300_v42, %v298_v44 }
 0x274   :  { %827 = vpow2.f32 %v232_v45  ;;  %v373_v51 = vsub.f32 %v351_v27, %v372_v48  ;;  %v376_v52 = vsub.f32 %v357_v28, %v372_v48  ;;  %v379_v53 = vsub.f32 %v363_v33, %v372_v48 }
 0x275   :  { %829 = vpow2.f32 %v235_v46  ;;  %v382_v54 = vsub.f32 %v369_v43, %v372_v48  ;;  %v302_v55 = vsub.f32 %v280_v25, %v301_v50  ;;  %v305_v56 = vsub.f32 %v286_v23, %v301_v50 }
 0x276   :  { %831 = vpow2.f32 %v238_v47  ;;  %v374_v57 = vmul.f32 1.442695, %v373_v51  ;;  %v377_v58 = vmul.f32 1.442695, %v376_v52  ;;  %v380_v59 = vmul.f32 1.442695, %v379_v53 }
 0x277   :  { %833 = vpow2.f32 %v241_v49  ;;  %v383_v60 = vmul.f32 1.442695, %v382_v54  ;;  %v303_v61 = vmul.f32 1.442695, %v302_v55  ;;  %v308_v62 = vsub.f32 %v292_v29, %v301_v50 }
 0x278   :  { %835 = vpow2.f32 %v374_v57  ;;  %v306_v63 = vmul.f32 1.442695, %v305_v56  ;;  %v311_v1 = vsub.f32 %v298_v44, %v301_v50  ;;  %v174_v53 = vmul.f32 %v1065_v16, %v1015_v7 }
 0x279   :  { %837 = vpow2.f32 %v377_v58  ;;  %v309_v2 = vmul.f32 1.442695, %v308_v62  ;;  %v809_v62 = vld [vmem:[%s1164_s3 + $0x8] sm:$0xff]  }
 0x27a   :  { %839 = vpow2.f32 %v380_v59  ;;  %v312_v4 = vmul.f32 1.442695, %v311_v1  ;;  %767 = vmatpush3.bf16.msra.mxu1 %v809_v62  ;;  %v810_v1 = vld [vmem:[%s1164_s3] sm:$0xff]  }
 0x27b   :  { %841 = vpow2.f32 %v383_v60  ;;  %768 = vmatprep.subr.bf16.mxu1 %v929_v0 }
 0x27c   :  { %843 = vpow2.f32 %v303_v61 }
 0x27d   :  { %845 = vpow2.f32 %v306_v63 }
 0x27e   :  { %847 = vpow2.f32 %v309_v2  ;;  %769 = vmatpush3.bf16.msra.mxu1 %v810_v1 }
 0x27f   :  { %849 = vpow2.f32 %v312_v4  ;;  %782 = vmatprep.subr.bf16.mxu1 %v929_v0 }
 0x281   :  { %v828_v5 = vpop.eup %827 }
 0x282   :  { %v830_v6 = vpop.eup %829 }
 0x283   :  { %v832_v8 = vpop.eup %831  ;;  %v243_v9 = vadd.f32 %v830_v6, %v828_v5 }
 0x284   :  { %v834_v10 = vpop.eup %833 }
 0x285   :  { %v836_v11 = vpop.eup %835  ;;  %v244_v12 = vadd.f32 %v832_v8, %v243_v9 }
 0x286   :  { %v838_v13 = vpop.eup %837 }
 0x287   :  { %v840_v14 = vpop.eup %839  ;;  %v245_v15 = vadd.f32 %v834_v10, %v244_v12  ;;  %v385_v17 = vadd.f32 %v838_v13, %v836_v11 }
 0x288   :  { %v842_v18 = vpop.eup %841 }
 0x289   :  { %v844_v19 = vpop.eup %843  ;;  %851 = vrcp.f32 %v245_v15  ;;  %v386_v20 = vadd.f32 %v840_v14, %v385_v17 }
 0x28a   :  { %v846_v21 = vpop.eup %845 }
 0x28b   :  { %v387_v22 = vadd.f32 %v842_v18, %v386_v20  ;;  %v314_v23 = vadd.f32 %v846_v21, %v844_v19  ;;  %v848_v24 = vpop.eup %847 }
 0x28c   :  { %v850_v26 = vpop.eup %849 }
 0x28d   :  { %853 = vrcp.f32 %v387_v22  ;;  %v315_v25 = vadd.f32 %v848_v24, %v314_v23 }
 0x28f   :  { %v316_v27 = vadd.f32 %v850_v26, %v315_v25 }
 0x291   :  { %855 = vrcp.f32 %v316_v27 }
 0x296   :  { %v852_v28 = vpop.eup %851 }
 0x297   :  { %v249_v29 = vmul.f32 %v852_v28, %v830_v6  ;;  %v247_v30 = vmul.f32 %v852_v28, %v828_v5  ;;  %v256_v42 = vmul.f32 %v852_v28, %v832_v8  ;;  %v263_v48 = vmul.f32 %v852_v28, %v834_v10  ;;  %v726_v28 = vld [vmem:[%s1168_s7] ss:$0 sm:$0xff] }
 0x299   :  { %v250_v31 = vmul.f32 %v249_v29, %v1015_v7  ;;  %v257_v44 = vmul.f32 %v256_v42, %v1015_v7  ;;  %v264_v49 = vmul.f32 %v263_v48, %v1015_v7  ;;  %v248_v16 = vmul.f32 %v247_v30, %v1015_v7 }
 0x29a   :  { %v854_v32 = vpop.eup %853 }
 0x29b   :  { %252 = vrot.lane.b32.xlu1 %v250_v31, %s936_s23  ;;  %v391_v33 = vmul.f32 %v854_v32, %v838_v13  ;;  %v389_v34 = vmul.f32 %v854_v32, %v836_v11  ;;  %v398_v36 = vmul.f32 %v854_v32, %v840_v14  ;;  %v405_v43 = vmul.f32 %v854_v32, %v842_v18 }
 0x29d   :  { %v392_v35 = vmul.f32 %v391_v33, %v1015_v7  ;;  %v399_v41 = vmul.f32 %v398_v36, %v1015_v7  ;;  %v406_v45 = vmul.f32 %v405_v43, %v1015_v7  ;;  %v390_v8 = vmul.f32 %v389_v34, %v1015_v7 }
 0x29e   :  { %v856_v37 = vpop.eup %855 }
 0x29f   :  { %394 = vrot.lane.b32.xlu0 %v392_v35, %s936_s23  ;;  %v320_v38 = vmul.f32 %v856_v37, %v846_v21  ;;  %v318_v39 = vmul.f32 %v856_v37, %v844_v19  ;;  %v327_v46 = vmul.f32 %v856_v37, %v848_v24  ;;  %v334_v50 = vmul.f32 %v856_v37, %v850_v26 }
 0x2a1   :  { %v321_v40 = vmul.f32 %v320_v38, %v1015_v7  ;;  %v328_v47 = vmul.f32 %v327_v46, %v1015_v7  ;;  %v335_v51 = vmul.f32 %v334_v50, %v1015_v7  ;;  %v319_v6 = vmul.f32 %v318_v39, %v1015_v7  ;;  %v811_v38 = vld [vmem:[%s1165_s4 + $0x8] sm:$0xff]   ;;  %v812_v39 = vld [vmem:[%s1165_s4] sm:$0xff]  }
 0x2a2   :  { %775 = vmatpush3.bf16.msra.mxu0 %v811_v38  ;;  %v730_v50 = vld [vmem:[%s1168_s7 + $0x1] ss:$0 sm:$0xff] }
 0x2a3   :  { %323 = vrot.lane.b32.xlu1 %v321_v40, %s936_s23  ;;  %401 = vrot.lane.b32.xlu0 %v399_v41, %s931_s1  ;;  %v814_v40 = vld [vmem:[%s1167_s6 + $0x10] sm:$0xff]  }
 0x2a4   :  { %776 = vmatprep.subr.bf16.mxu0 %v929_v0 }
 0x2a6   :  { %777 = vmatpush3.bf16.msra.mxu0 %v812_v39 }
 0x2a7   :  { %259 = vrot.lane.b32.xlu1 %v257_v44, %s931_s1  ;;  %408 = vrot.lane.b32.xlu0 %v406_v45, %s934_s22 }
 0x2ab   :  { %330 = vrot.lane.b32.xlu1 %v328_v47, %s931_s1 }
 0x2af   :  { %266 = vrot.lane.b32.xlu1 %v264_v49, %s934_s22 }
 0x2b3   :  { %337 = vrot.lane.b32.xlu1 %v335_v51, %s934_s22 }
 0x2c2   :  { %v179_v52 = vpop.permute.xlu0 %178 }
 0x2c3   :  { %v181_v55 = vadd.f32 %v179_v52, %v174_v53  ;;  %v731_v52 = vld [vmem:[%s1168_s7 + $0x2] ss:$0 sm:$0xff] }
 0x2c6   :  { %v186_v54 = vpop.permute.xlu0 %185 }
 0x2c7   :  { %v188_v56 = vadd.f32 %v186_v54, %v181_v55 }
 0x2ca   :  { %v193_v57 = vpop.permute.xlu0 %192 }
 0x2cb   :  { %v195_v58 = vadd.f32 %v193_v57, %v188_v56  ;;  %v815_v56 = vld [vmem:[%s1167_s6 + $0x8] sm:$0xff]   ;;  %v816_v57 = vld [vmem:[%s1167_s6] sm:$0xff]  }
 0x2cd   :  { %413 = vrot.lane.b32.xlu1 %v195_v58, %s938_s25  ;;  %v732_v58 = vld [vmem:[#allocation5] ss:$0 sm:$0xff]  ;;  %s939_s25 = smov [#allocation7]  }
 0x2ce   :  { %s712_s26 = sshll.u32 %s939_s25, 4  ;;  %s713_s26 = int_to_ptr.vmem [resolvable:$true] %s712_s26 }
 0x2cf   :  { %s901_s27 = scalar_lea.vmem %s713_s26, 128  ;;  %p906_p11 = scmp.lt.s32.totalorder %s713_s26, %s713_s26 }
 0x2d0   :  { %p902_p10 = scmp.ne.s32.totalorder %s713_s26, %s901_s27  ;;  %p907_p12 = scmp.lt.s32.totalorder %s901_s27, %s901_s27 }
 0x2d2   :  { %p908_p13 = por %p907_p12, %p906_p11 }
 0x2d4   :  { %p909_p0 = pnand %p908_p13, %p902_p10 }
 0x30d   :  { %v253_v59 = vpop.permute.xlu1 %252 }
 0x30e   :  { %v255_v5 = vadd.f32 %v253_v59, %v248_v16 }
 0x311   :  { %v395_v61 = vpop.permute.xlu0 %394 }
 0x312   :  { %v397_v12 = vadd.f32 %v395_v61, %v390_v8 }
 0x315   :  { %v324_v60 = vpop.permute.xlu1 %323  ;;  %v402_v2 = vpop.permute.xlu0 %401 }
 0x316   :  { %v326_v11 = vadd.f32 %v324_v60, %v319_v6  ;;  %v404_v15 = vadd.f32 %v402_v2, %v397_v12  ;;  %v736_v2 = vld [vmem:[%s1168_s7 + $0x3] ss:$0 sm:$0xff] }
 0x319   :  { %v260_v63 = vpop.permute.xlu1 %259  ;;  %v409_v14 = vpop.permute.xlu0 %408 }
 0x31a   :  { %v262_v9 = vadd.f32 %v260_v63, %v255_v5  ;;  %v411_v19 = vadd.f32 %v409_v14, %v404_v15 }
 0x31d   :  { %v331_v4 = vpop.permute.xlu1 %330 }
 0x31e   :  { %v333_v17 = vadd.f32 %v331_v4, %v326_v11 }
 0x321   :  { %v267_v10 = vpop.permute.xlu1 %266 }
 0x322   :  { %v269_v13 = vadd.f32 %v267_v10, %v262_v9 }
 0x324   :  { %417 = vrot.lane.b32.xlu0 %v269_v13, %s937_s24 }
 0x325   :  { %v338_v18 = vpop.permute.xlu1 %337 }
 0x326   :  { %v340_v20 = vadd.f32 %v338_v18, %v333_v17 }
 0x328   :  { %421 = vrot.lane.b32.xlu1 %v340_v20, %s935_s2  ;;  %425 = vrot.lane.b32.xlu0 %v411_v19, %s933_s21 }
 0x33f   :  { %v414_v21 = vpop.permute.xlu1 %413 }
 0x396   :  { %v418_v22 = vpop.permute.xlu0 %417 }
 0x397   :  { %v428_v7 = vsel %vm129_vm2, %v414_v21, %v418_v22 }
 0x39a   :  { %v422_v23 = vpop.permute.xlu1 %421  ;;  %v426_v24 = vpop.permute.xlu0 %425 }
 0x39b   :  { %v430_v25 = vsel %vm429_vm3, %v428_v7, %v422_v23  ;;  %v742_v7 = vld [vmem:[%s1168_s7 + $0x4] ss:$0 sm:$0xff] }
 0x39c   :  { %v432_v26 = vsel %vm431_vm4, %v430_v25, %v426_v24  ;;  %v743_v24 = vld [vmem:[%s1168_s7 + $0x5] ss:$0 sm:$0xff] }
 0x39d   :  { %v433_v27 = vpack.c.bf16 %v432_v26, %v432_v26 }
 0x39f   :  { %771 = vmatmul.mubr.msk.bf16.vlgmr.msra.gmra.mxu1 %vm80_vm1, %v433_v27 }
 0x3a0   :  { %790 = vmatprep.mubr.msk.bf16.mxu1 %vm930_vm0, %v929_v0 }
 0x45f   :  { %v492_v29 = vpop.f32.mrf.mxu1 }
 0x460   :  { %v493_v30 = vadd.f32 %v726_v28, %v492_v29 }
 0x461   :  { %v772_v31 = vpop.f32.mrf.mxu1 }
 0x462   :  { %v498_v32 = vadd.f32 %v493_v30, %v1003_v3  ;;  %v813_v3 = vld [vmem:[%s1167_s6 + $0x18] sm:$0xff]  }
 0x463   :  { %v495_v33 = vpop.f32.mrf.mxu1  ;;  %783 = vmatpush3.bf16.msra.mxu1 %v813_v3 }
 0x464   :  { %v499_v34 = vsel %vm80_vm1, %v498_v32, 0.0  ;;  %v504_v35 = vmul.f32 %v498_v32, %v498_v32  ;;  %784 = vmatprep.subr.bf16.mxu1 %v929_v0 }
 0x465   :  { %500 = vadd.xlane.f32.xlu1 %v499_v34  ;;  %v773_v36 = vpop.f32.mrf.mxu1 }
 0x466   :  { %v505_v37 = vsel %vm80_vm1, %v504_v35, 0.0 }
 0x467   :  { %506 = vadd.xlane.f32.xlu0 %v505_v37  ;;  %785 = vmatpush3.bf16.msra.mxu1 %v814_v40 }
 0x468   :  { %786 = vmatprep.subr.bf16.mxu1 %v929_v0 }
 0x46b   :  { %787 = vmatpush3.bf16.msra.mxu1 %v815_v56 }
 0x46c   :  { %788 = vmatprep.subr.bf16.mxu1 %v929_v0 }
 0x46f   :  { %789 = vmatpush3.bf16.msra.mxu1 %v816_v57 }
 0x4ee   :  { %v501_v41 = vpop.xlane.xlu1 %500 }
 0x4ef   :  { %v503_v42 = vmul.f32 0.03125, %v501_v41 }
 0x4f0   :  { %v507_v43 = vpop.xlane.xlu0 %506 }
 0x4f1   :  { %v509_v44 = vmul.f32 %v503_v42, %v503_v42  ;;  %v508_v45 = vmul.f32 0.03125, %v507_v43  ;;  %v511_v48 = vsub.f32 %v498_v32, %v503_v42 }
 0x4f3   :  { %v510_v46 = vsub.f32 %v508_v45, %v509_v44 }
 0x4f5   :  { %v512_v47 = vadd.f32 1e-05, %v510_v46 }
 0x4f7   :  { %857 = vrsqrt.f32 %v512_v47 }
 0x504   :  { %v858_v49 = vpop.eup %857 }
 0x505   :  { %v514_v51 = vmul.f32 %v858_v49, %v511_v48 }
 0x507   :  { %v520_v53 = vmul.f32 %v730_v50, %v514_v51 }
 0x509   :  { %v526_v54 = vadd.f32 %v731_v52, %v520_v53 }
 0x50b   :  { %v527_v55 = vpack.c.bf16 %v526_v54, %v526_v54 }
 0x50d   :  { %779 = vmatmul.mubr.msk.bf16.vlgmr.msra.gmra.mxu0 %vm80_vm1, %v527_v55 }
 0x5cd   :  { %v588_v59 = vpop.f32.mrf.mxu0 }
 0x5ce   :  { %v589_v60 = vadd.f32 %v732_v58, %v588_v59 }
 0x5cf   :  { %v780_v61 = vpop.f32.mrf.mxu0 }
 0x5d0   :  { %v594_v62 = vmax.f32 %v589_v60, 0.0 }
 0x5d1   :  { %v591_v63 = vpop.f32.mrf.mxu0 }
 0x5d2   :  { %v595_v16 = vpack.c.bf16 %v594_v62, %v594_v62 }
 0x5d3   :  { %v781_v1 = vpop.f32.mrf.mxu0 }
 0x5d4   :  { %791 = vmatmul.mubr.msk.bf16.vlgmr.msra.gmra.mxu1 %vm633_vm5, %v595_v16 }
 0x694   :  { %v671_v0 = vpop.f32.mrf.mxu1 }
 0x695   :  { %v672_v4 = vadd.f32 %v736_v2, %v671_v0 }
 0x696   :  { %v792_v5 = vpop.f32.mrf.mxu1 }
 0x697   :  { %v677_v6 = vadd.f32 %v672_v4, %v526_v54 }
 0x698   :  { %v674_v8 = vpop.f32.mrf.mxu1 }
 0x699   :  { %v678_v9 = vsel %vm80_vm1, %v677_v6, 0.0  ;;  %v682_v10 = vmul.f32 %v677_v6, %v677_v6 }
 0x69a   :  { %679 = vadd.xlane.f32.xlu0 %v678_v9  ;;  %v793_v11 = vpop.f32.mrf.mxu1 }
 0x69b   :  { %v683_v12 = vsel %vm80_vm1, %v682_v10, 0.0 }
 0x69c   :  { %684 = vadd.xlane.f32.xlu1 %v683_v12 }
 0x723   :  { %v680_v13 = vpop.xlane.xlu0 %679 }
 0x724   :  { %v681_v14 = vmul.f32 0.03125, %v680_v13 }
 0x725   :  { %v685_v15 = vpop.xlane.xlu1 %684 }
 0x726   :  { %v687_v17 = vmul.f32 %v681_v14, %v681_v14  ;;  %v686_v18 = vmul.f32 0.03125, %v685_v15  ;;  %v689_v21 = vsub.f32 %v677_v6, %v681_v14 }
 0x728   :  { %v688_v19 = vsub.f32 %v686_v18, %v687_v17 }
 0x72a   :  { %v690_v20 = vadd.f32 1e-05, %v688_v19 }
 0x72c   :  { %859 = vrsqrt.f32 %v690_v20 }
 0x739   :  { %v860_v22 = vpop.eup %859 }
 0x73a   :  { %v692_v23 = vmul.f32 %v860_v22, %v689_v21 }
 0x73c   :  { %v698_v25 = vmul.f32 %v742_v7, %v692_v23 }
 0x73e   :  { %v704_v26 = vadd.f32 %v743_v24, %v698_v25 }
 0x740   :  { %705 = vst.msk [vmem:[#allocation7] sm:$0xff] %vm80_vm1, %v704_v26 }
 0x741   :  { %912 = shalt.err (!%p909_p0)
}
 0x742   :  { %715 = dma.vmem_to_hbm [thread:$0]  %s713_s26, 128, %s1169_s8, [#allocation4]  }
 0x743   :  { %925 = dma.done.wait [#allocation4], 128  }
 0x744   :  { %926 = vsyncadd [#allocation4], 4294967168 }
 0x745   :  { %719 = vsyncpa [#allocation3], 1 }
 0x746   :  { %720 = vsyncpa [#allocation6], 1 }
 0x747   :  { %721 = vsyncpa [#allocation4], 1 }

</bundles_post_ra>
